<compile_context>
chip_gen: v7x
topology: tpu7x:2x2x1
jax: 0.10.0
libtpu: 0.0.40
codegen_flags: <defaults>
</compile_context>

<pallas_src>
import jax
import jax.numpy as jnp
from jax.experimental import pallas as pl
from jax.experimental.pallas import tpu as pltpu


def _attention_pool_kernel(x_ref, q_ref, wkT_ref, wv_ref, bkq_ref, bv_ref,
                           wpT_ref, bp_ref, o_ref):
    """One grid step == TB batch elements.

    x_ref   : [TB, N, C]  activation tile (streaming dtype: f32 or bf16)
    q_ref   : [1, 1, C]   Linear_q(cls_q)                        (f32)
    wkT_ref : [N, C]      Wvk[:C].T                              (f32)
    wv_ref  : [C, N]      Wvk[C:]                                (f32)
    bkq_ref : [1, C]      sum(q) * bvk[:C]   (bias pre-folded)   (f32)
    bv_ref  : [1, C]      bvk[C:]                                (f32)
    wpT_ref : [C, out]    Wproj.T                                (f32)
    bp_ref  : [1, out]    bproj                                  (f32)
    o_ref   : [TB, out]   output tile (size-1 middle dim squeezed by BlockSpec)
    """
    f32 = jnp.float32

    # Single upcast of the streamed tile, reused by both x-contractions below,
    # so every VPU op runs in f32 (v5e has no bf16 VPU); accumulation is f32.
    xf = x_ref[...].astype(f32)                                   # [TB, N, C]

    # qx[b, n] = sum_c x[b, n, c] * q[c]
    # broadcast-multiply + lane reduce (VPU/XLU) -- no per-batch M=1 matmuls.
    qx = jnp.sum(xf * q_ref[...], axis=-1)                        # [TB, N]

    # logits = qx @ Wk^T + sum(q) * bk  -- one MXU matmul for the whole tile.
    logits = jnp.dot(qx, wkT_ref[...], preferred_element_type=f32) + bkq_ref[...]

    # Numerically stable softmax over channels; reciprocal on the EUP slot.
    logits = logits - jnp.max(logits, axis=-1, keepdims=True)
    p = jnp.exp(logits)
    attn = p * pl.reciprocal(jnp.sum(p, axis=-1, keepdims=True), approx=True)

    # wa = attn @ Wv ; bconst = attn . bv
    wa = jnp.dot(attn, wv_ref[...], preferred_element_type=f32)   # [TB, N]
    bconst = jnp.sum(attn * bv_ref[...], axis=-1, keepdims=True)  # [TB, 1]

    # y[b, c] = sum_n wa[b, n] * x[b, n, c] + bconst[b]
    # broadcast-multiply + sublane reduce (VPU) -- again no batched matmuls.
    y = jnp.sum(xf * wa[:, :, None], axis=1) + bconst             # [TB, C]

    # out = y @ Wproj^T + bproj  -- single small matmul (no per-column loop).
    o_ref[...] = (jnp.dot(y, wpT_ref[...], preferred_element_type=f32)
                  + bp_ref[...]).astype(o_ref.dtype)


def _pick_batch_tiling(B, N, C, itemsize, *, max_block_bytes=2 * 1024 * 1024,
                       target_steps=8):
    """Pick (TB, B_padded): ~1-2 MiB x blocks, >= ~target_steps grid steps.

    Prefers an exact divisor of B; if B has no reasonable divisor, returns a
    padded batch size so every block stays full (no TB=1 cliff).
    """
    bytes_per_b = max(1, N * C * itemsize)
    cap = max(1, max_block_bytes // bytes_per_b)         # VMEM-driven cap
    if B >= 2 * target_steps:
        cap = min(cap, B // target_steps)                # keep >= ~target_steps steps
    cap = min(cap, B)
    if cap >= B:
        return B, B                                      # tiny batch: single block
    best = 1
    for d in range(1, cap + 1):
        if B % d == 0:
            best = d
    if 2 * best >= cap:                                  # good divisor -> no padding
        return best, B
    tb = cap                                             # pad the batch instead
    return tb, pl.cdiv(B, tb) * tb


def attention_pool2d(x, cls_q, params, *, block_b=None, interpret=False):
    """Pallas wrapper. x: [B, N, C] (N == C required), cls_q: [C] -> [B, out].

    x streams in its own dtype (bf16 recommended in production); weights,
    softmax and all accumulation stay in float32.
    """
    B, N, C = x.shape
    assert N == C, "AttentionPool2d forward only well-defined when timesteps == channels"
    out_f = params["Wproj"].shape[0]
    f32 = jnp.float32

    # Tiny host-side weight prep only; x itself is passed through untouched
    # (except optional zero-padding of the batch axis for awkward B).
    q_vec = cls_q.astype(f32) @ params["Wq"].T.astype(f32) + params["bq"].astype(f32)
    q3 = q_vec.reshape(1, 1, C)                                       # [1, 1, C] f32
    qsum = jnp.sum(q_vec)
    wkT = params["Wvk"][:C].T.astype(f32)                             # [N, C]
    wv = params["Wvk"][C:].astype(f32)                                # [C, N]
    bkq = (qsum * params["bvk"][:C].astype(f32)).reshape(1, C)        # sum(q)*bk folded
    bv = params["bvk"][C:].astype(f32).reshape(1, C)
    wpT = params["Wproj"].T.astype(f32)                               # [C, out_f]
    bp = params["bproj"].astype(f32).reshape(1, out_f)

    if block_b is None:
        TB, B_pad = _pick_batch_tiling(B, N, C, x.dtype.itemsize)
    else:
        TB = max(1, int(block_b))
        B_pad = pl.cdiv(B, TB) * TB
    if B_pad != B:
        # Zero rows: softmax stays finite; padded outputs are sliced off below.
        x = jnp.pad(x, ((0, B_pad - B), (0, 0), (0, 0)))
    grid = (B_pad // TB,)

    # Right-size the VMEM request: 2x double-buffered x block + f32 upcast /
    # product temporaries + weights & headroom (default tiling -> 24 MiB).
    block_bytes = TB * N * C * x.dtype.itemsize
    block_f32 = TB * N * C * 4
    vmem_limit = int(max(24 * 1024 * 1024,
                         2 * block_bytes + 4 * block_f32 + (2 << 20)))

    out3 = pl.pallas_call(
        _attention_pool_kernel,
        out_shape=jax.ShapeDtypeStruct((B_pad, 1, out_f), f32),
        grid_spec=pltpu.PrefetchScalarGridSpec(
            num_scalar_prefetch=0,
            grid=grid,
            in_specs=[
                pl.BlockSpec((TB, N, C), lambda i: (i, 0, 0)),   # x tile, per step
                pl.BlockSpec((1, 1, C), lambda i: (0, 0, 0)),    # q (grid-invariant)
                pl.BlockSpec((N, C), lambda i: (0, 0)),          # Wk^T
                pl.BlockSpec((C, N), lambda i: (0, 0)),          # Wv
                pl.BlockSpec((1, C), lambda i: (0, 0)),          # sum(q)*bk
                pl.BlockSpec((1, C), lambda i: (0, 0)),          # bv
                pl.BlockSpec((C, out_f), lambda i: (0, 0)),      # Wproj^T
                pl.BlockSpec((1, out_f), lambda i: (0, 0)),      # bproj
            ],
            # Size-1 middle dim is squeezed -> kernel writes a [TB, out_f] tile.
            out_specs=pl.BlockSpec((TB, None, out_f), lambda i: (i, 0, 0)),
        ),
        compiler_params=pltpu.CompilerParams(
            dimension_semantics=("parallel",),
            vmem_limit_bytes=vmem_limit,
        ),
        interpret=interpret,
    )(x, q3, wkT, wv, bkq, bv, wpT, bp)

    out = out3.reshape(B_pad, out_f)
    return out[:B] if B_pad != B else out


def ref_forward(x, cls_q, params):
    """Literal JAX transcription of the PyTorch forward (for verification)."""
    B, N, C = x.shape
    xt = jnp.transpose(x, (0, 2, 1))                                       # x.transpose(1, 2)
    q = cls_q @ params["Wq"].T + params["bq"]                              # self.q(cls_q.expand(...))
    q = jnp.broadcast_to(q.reshape(1, 1, C), (B, 1, C))
    vk = jnp.einsum("bcn,jn->bcj", xt, params["Wvk"]) + params["bvk"]      # self.vk(x): [B, C, 2C]
    vk = vk.reshape(B, N, 2, C)
    vk = jnp.transpose(vk, (2, 0, 1, 3))                                   # permute(2, 0, 1, 3)
    k, v = vk[0], vk[1]                                                    # chunk + squeeze
    k = jnp.swapaxes(k, 1, 2)                                              # [B, C, N]
    v = jnp.swapaxes(v, 1, 2)
    attn = jnp.matmul(q, jnp.swapaxes(k, -2, -1))                          # [B, 1, C]
    attn = jax.nn.softmax(attn, axis=-1)
    y = jnp.matmul(attn, v)                                                # [B, 1, N]
    y = jnp.swapaxes(y, 1, 2).reshape(B, N)                                # transpose + flatten(1)
    return y @ params["Wproj"].T + params["bproj"]                         # self.proj


def init_params(key, ni, out=1):
    ks = jax.random.split(key, 6)
    s = 0.02
    return {
        "Wq": s * jax.random.normal(ks[0], (ni, ni), jnp.float32),
        "bq": s * jax.random.normal(ks[1], (ni,), jnp.float32),
        "Wvk": s * jax.random.normal(ks[2], (2 * ni, ni), jnp.float32),
        "bvk": s * jax.random.normal(ks[3], (2 * ni,), jnp.float32),
        "Wproj": s * jax.random.normal(ks[4], (out, ni), jnp.float32),
        "bproj": s * jax.random.normal(ks[5], (out,), jnp.float32),
    }


if __name__ == "__main__":
    OUT = 1
    B, N, C = 4, 16, 16                 # small; N must equal C (see layout note)
    key = jax.random.PRNGKey(0)
    kx, kq, kp = jax.random.split(key, 3)
    x = jax.random.normal(kx, (B, N, C), jnp.float32)
    cls_q = jax.random.normal(kq, (C,), jnp.float32)
    params = init_params(kp, C, OUT)

    ref = ref_forward(x, cls_q, params)

    # f32 activation path (tolerance covers the approx softmax reciprocal).
    out_f32 = jax.block_until_ready(attention_pool2d(x, cls_q, params))
    assert out_f32.shape == (B, OUT), out_f32.shape
    assert jnp.allclose(out_f32, ref, atol=2e-3, rtol=2e-3), \
        float(jnp.max(jnp.abs(out_f32 - ref)))

    # bf16 streaming path (recommended production setting): looser tolerance.
    out_bf16 = jax.block_until_ready(
        attention_pool2d(x.astype(jnp.bfloat16), cls_q, params))
    assert jnp.allclose(out_bf16, ref, atol=3e-2, rtol=3e-2), \
        float(jnp.max(jnp.abs(out_bf16 - ref)))

    # Padded-batch path: B=6 with block_b=4 exercises the zero-padded last tile.
    B2 = 6
    x2 = jax.random.normal(kx, (B2, N, C), jnp.float32)
    out_pad = jax.block_until_ready(
        attention_pool2d(x2, cls_q, params, block_b=4))
    ref_pad = ref_forward(x2, cls_q, params)
    assert out_pad.shape == (B2, OUT), out_pad.shape
    assert jnp.allclose(out_pad, ref_pad, atol=2e-3, rtol=2e-3), \
        float(jnp.max(jnp.abs(out_pad - ref_pad)))

    print("KERNEL_OK")
</pallas_src>

<mosaic_0001>
module attributes {stable_mosaic.version = 11 : i64} {
  func.func @_attention_pool_kernel(%arg0: i32, %arg1: memref<4x16x16xf32, #tpu.memory_space<vmem>>, %arg2: memref<1x1x16xf32, #tpu.memory_space<vmem>>, %arg3: memref<16x16xf32, #tpu.memory_space<vmem>>, %arg4: memref<16x16xf32, #tpu.memory_space<vmem>>, %arg5: memref<1x16xf32, #tpu.memory_space<vmem>>, %arg6: memref<1x16xf32, #tpu.memory_space<vmem>>, %arg7: memref<16x1xf32, #tpu.memory_space<vmem>>, %arg8: memref<1x1xf32, #tpu.memory_space<vmem>>, %arg9: memref<4x1x1xf32, #tpu.memory_space<vmem>>) attributes {dimension_semantics = [#tpu.dimension_semantics<parallel>], iteration_bounds = array<i64: 1>, scalar_prefetch = 0 : i64, scratch_operands = 0 : i64, tpu.core_type = #tpu.core_type<tc>, window_params = [{transform_indices = @transform_0, window_bounds = array<i64: 4, 16, 16>}, {pipeline_mode = #tpu.pipeline_mode<synchronous>, transform_indices = @transform_1, window_bounds = array<i64: 1, 1, 16>}, {pipeline_mode = #tpu.pipeline_mode<synchronous>, transform_indices = @transform_2, window_bounds = array<i64: 16, 16>}, {pipeline_mode = #tpu.pipeline_mode<synchronous>, transform_indices = @transform_3, window_bounds = array<i64: 16, 16>}, {pipeline_mode = #tpu.pipeline_mode<synchronous>, transform_indices = @transform_4, window_bounds = array<i64: 1, 16>}, {pipeline_mode = #tpu.pipeline_mode<synchronous>, transform_indices = @transform_5, window_bounds = array<i64: 1, 16>}, {pipeline_mode = #tpu.pipeline_mode<synchronous>, transform_indices = @transform_6, window_bounds = array<i64: 16, 1>}, {pipeline_mode = #tpu.pipeline_mode<synchronous>, transform_indices = @transform_7, window_bounds = array<i64: 1, 1>}, {transform_indices = @transform_8, window_bounds = array<i64: 4, 1, 1>}]} {
    %c0 = arith.constant 0 : index
    %c0_0 = arith.constant 0 : index
    %c0_1 = arith.constant 0 : index
    %0 = vector.load %arg1[%c0, %c0_0, %c0_1] : memref<4x16x16xf32, #tpu.memory_space<vmem>>, vector<4x16x16xf32>
    %c0_2 = arith.constant 0 : index
    %c0_3 = arith.constant 0 : index
    %c0_4 = arith.constant 0 : index
    %1 = vector.load %arg2[%c0_2, %c0_3, %c0_4] : memref<1x1x16xf32, #tpu.memory_space<vmem>>, vector<1x1x16xf32>
    %2 = vector.broadcast %1 : vector<1x1x16xf32> to vector<4x16x16xf32>
    %3 = arith.mulf %0, %2 : vector<4x16x16xf32>
    %cst = arith.constant dense<0.000000e+00> : vector<4x16xf32>
    %4 = vector.multi_reduction <add>, %3, %cst [2] : vector<4x16x16xf32> to vector<4x16xf32>
    %c0_5 = arith.constant 0 : index
    %c0_6 = arith.constant 0 : index
    %5 = vector.load %arg3[%c0_5, %c0_6] : memref<16x16xf32, #tpu.memory_space<vmem>>, vector<16x16xf32>
    %cst_7 = arith.constant dense<0.000000e+00> : vector<4x16xf32>
    %6 = tpu.matmul %4, %5, %cst_7 {dimension_numbers = #tpu.dot_dimension_numbers<[1], [0], [0], [1], [0, 0, 1, 1], [], []>} : vector<4x16xf32>, vector<16x16xf32>, vector<4x16xf32> -> vector<4x16xf32>
    %c0_8 = arith.constant 0 : index
    %c0_9 = arith.constant 0 : index
    %7 = vector.load %arg5[%c0_8, %c0_9] : memref<1x16xf32, #tpu.memory_space<vmem>>, vector<1x16xf32>
    %8 = vector.broadcast %7 : vector<1x16xf32> to vector<4x16xf32>
    %9 = arith.addf %6, %8 : vector<4x16xf32>
    %cst_10 = arith.constant dense<0xFF800000> : vector<4xf32>
    %10 = vector.multi_reduction <maximumf>, %9, %cst_10 [1] : vector<4x16xf32> to vector<4xf32>
    %11 = vector.shape_cast %10 : vector<4xf32> to vector<4x1xf32>
    %12 = vector.broadcast %11 : vector<4x1xf32> to vector<4x16xf32>
    %13 = arith.subf %9, %12 : vector<4x16xf32>
    %14 = math.exp %13 : vector<4x16xf32>
    %cst_11 = arith.constant dense<0.000000e+00> : vector<4xf32>
    %15 = vector.multi_reduction <add>, %14, %cst_11 [1] : vector<4x16xf32> to vector<4xf32>
    %16 = vector.shape_cast %15 : vector<4xf32> to vector<4x1xf32>
    %17 = tpu.reciprocal %16 {approx = true} : vector<4x1xf32> -> vector<4x1xf32>
    %18 = vector.broadcast %17 : vector<4x1xf32> to vector<4x16xf32>
    %19 = arith.mulf %14, %18 : vector<4x16xf32>
    %c0_12 = arith.constant 0 : index
    %c0_13 = arith.constant 0 : index
    %20 = vector.load %arg4[%c0_12, %c0_13] : memref<16x16xf32, #tpu.memory_space<vmem>>, vector<16x16xf32>
    %cst_14 = arith.constant dense<0.000000e+00> : vector<4x16xf32>
    %21 = tpu.matmul %19, %20, %cst_14 {dimension_numbers = #tpu.dot_dimension_numbers<[1], [0], [0], [1], [0, 0, 1, 1], [], []>} : vector<4x16xf32>, vector<16x16xf32>, vector<4x16xf32> -> vector<4x16xf32>
    %c0_15 = arith.constant 0 : index
    %c0_16 = arith.constant 0 : index
    %22 = vector.load %arg6[%c0_15, %c0_16] : memref<1x16xf32, #tpu.memory_space<vmem>>, vector<1x16xf32>
    %23 = vector.broadcast %22 : vector<1x16xf32> to vector<4x16xf32>
    %24 = arith.mulf %19, %23 : vector<4x16xf32>
    %cst_17 = arith.constant dense<0.000000e+00> : vector<4xf32>
    %25 = vector.multi_reduction <add>, %24, %cst_17 [1] : vector<4x16xf32> to vector<4xf32>
    %26 = vector.shape_cast %25 : vector<4xf32> to vector<4x1xf32>
    %27 = vector.shape_cast %21 : vector<4x16xf32> to vector<4x16x1xf32>
    %28 = vector.broadcast %27 : vector<4x16x1xf32> to vector<4x16x16xf32>
    %29 = arith.mulf %0, %28 : vector<4x16x16xf32>
    %cst_18 = arith.constant dense<0.000000e+00> : vector<4x16xf32>
    %30 = vector.multi_reduction <add>, %29, %cst_18 [1] : vector<4x16x16xf32> to vector<4x16xf32>
    %31 = vector.broadcast %26 : vector<4x1xf32> to vector<4x16xf32>
    %32 = arith.addf %30, %31 : vector<4x16xf32>
    %c0_19 = arith.constant 0 : index
    %c0_20 = arith.constant 0 : index
    %33 = vector.load %arg7[%c0_19, %c0_20] : memref<16x1xf32, #tpu.memory_space<vmem>>, vector<16x1xf32>
    %cst_21 = arith.constant dense<0.000000e+00> : vector<4x1xf32>
    %34 = tpu.matmul %32, %33, %cst_21 {dimension_numbers = #tpu.dot_dimension_numbers<[1], [0], [0], [1], [0, 0, 1, 1], [], []>} : vector<4x16xf32>, vector<16x1xf32>, vector<4x1xf32> -> vector<4x1xf32>
    %c0_22 = arith.constant 0 : index
    %c0_23 = arith.constant 0 : index
    %35 = vector.load %arg8[%c0_22, %c0_23] : memref<1x1xf32, #tpu.memory_space<vmem>>, vector<1x1xf32>
    %36 = vector.broadcast %35 : vector<1x1xf32> to vector<4x1xf32>
    %37 = arith.addf %34, %36 : vector<4x1xf32>
    %c0_24 = arith.constant 0 : index
    %c0_25 = arith.constant 0 : index
    %c0_26 = arith.constant 0 : index
    %38 = vector.load %arg9[%c0_24, %c0_25, %c0_26] : memref<4x1x1xf32, #tpu.memory_space<vmem>>, vector<4x1x1xf32>
    %39 = vector.shape_cast %38 : vector<4x1x1xf32> to vector<4x1xf32>
    %40 = vector.shape_cast %37 : vector<4x1xf32> to vector<4x1x1xf32>
    tpu.vector_store %arg9[%c0_24, %c0_25, %c0_26], %40 {strides = array<i32>} : memref<4x1x1xf32, #tpu.memory_space<vmem>>, vector<4x1x1xf32>,
    return
  }
  func.func @transform_0(%arg0: i32) -> (i32, i32, i32) {
    %c0_i32 = arith.constant 0 : i32
    %c0_i32_0 = arith.constant 0 : i32
    %c0_i32_1 = arith.constant 0 : i32
    return %arg0, %c0_i32, %c0_i32_0 : i32, i32, i32
  }
  func.func @transform_1(%arg0: i32) -> (i32, i32, i32) {
    %c0_i32 = arith.constant 0 : i32
    %c0_i32_0 = arith.constant 0 : i32
    %c0_i32_1 = arith.constant 0 : i32
    %c0_i32_2 = arith.constant 0 : i32
    return %c0_i32, %c0_i32_0, %c0_i32_1 : i32, i32, i32
  }
  func.func @transform_2(%arg0: i32) -> (i32, i32) {
    %c0_i32 = arith.constant 0 : i32
    %c0_i32_0 = arith.constant 0 : i32
    %c0_i32_1 = arith.constant 0 : i32
    return %c0_i32, %c0_i32_0 : i32, i32
  }
  func.func @transform_3(%arg0: i32) -> (i32, i32) {
    %c0_i32 = arith.constant 0 : i32
    %c0_i32_0 = arith.constant 0 : i32
    %c0_i32_1 = arith.constant 0 : i32
    return %c0_i32, %c0_i32_0 : i32, i32
  }
  func.func @transform_4(%arg0: i32) -> (i32, i32) {
    %c0_i32 = arith.constant 0 : i32
    %c0_i32_0 = arith.constant 0 : i32
    %c0_i32_1 = arith.constant 0 : i32
    return %c0_i32, %c0_i32_0 : i32, i32
  }
  func.func @transform_5(%arg0: i32) -> (i32, i32) {
    %c0_i32 = arith.constant 0 : i32
    %c0_i32_0 = arith.constant 0 : i32
    %c0_i32_1 = arith.constant 0 : i32
    return %c0_i32, %c0_i32_0 : i32, i32
  }
  func.func @transform_6(%arg0: i32) -> (i32, i32) {
    %c0_i32 = arith.constant 0 : i32
    %c0_i32_0 = arith.constant 0 : i32
    %c0_i32_1 = arith.constant 0 : i32
    return %c0_i32, %c0_i32_0 : i32, i32
  }
  func.func @transform_7(%arg0: i32) -> (i32, i32) {
    %c0_i32 = arith.constant 0 : i32
    %c0_i32_0 = arith.constant 0 : i32
    %c0_i32_1 = arith.constant 0 : i32
    return %c0_i32, %c0_i32_0 : i32, i32
  }
  func.func @transform_8(%arg0: i32) -> (i32, i32, i32) {
    %c0_i32 = arith.constant 0 : i32
    %c0_i32_0 = arith.constant 0 : i32
    %c0_i32_1 = arith.constant 0 : i32
    return %arg0, %c0_i32, %c0_i32_0 : i32, i32, i32
  }
}

</mosaic_0001>

<bundles_post_ra>
// kernel: tpu_custom_call.1
= control target key start
LH: loop header
LB: loop body
LE: loop exit
PB: predicated region body
PF: predicated region fallthrough
CT: control target
= control target key end

     0   :  { %s867_s0 = inlined_call_operand.hbm [shape: f32[4,16,16], index: 0, kind: input, shape index: {}]   ;;  %s868_s1 = inlined_call_operand.hbm [shape: f32[1,1,16], index: 1, kind: input, shape index: {}]   ;;  %s869_s2 = inlined_call_operand.vmem [shape: f32[16,16], index: 2, kind: input, shape index: {}]   ;;  %s870_s3 = inlined_call_operand.vmem [shape: f32[16,16], index: 3, kind: input, shape index: {}]   ;;  %s871_s4 = inlined_call_operand.vmem [shape: f32[1,16], index: 4, kind: input, shape index: {}]   ;;  %s872_s5 = inlined_call_operand.vmem [shape: f32[1,16], index: 5, kind: input, shape index: {}]   ;;  %s873_s6 = inlined_call_operand.vmem [shape: f32[16,1], index: 6, kind: input, shape index: {}]   ;;  %s874_s7 = inlined_call_operand.<no memory space> [shape: f32[1,1], index: 7, kind: input, shape index: {}]   ;;  %s875_s8 = inlined_call_operand.vmem [shape: f32[4,1,1], index: 8, kind: output, shape index: {}]  }
   0x1   :  { %v13_v0 = vstv %s874_s7 }
   0x2   :  { %14 = vst [vmem:[#allocation2] sm:$0x1] %v13_v0 }
   0x3   :  { %15 = vsyncpa [#allocation4], 0 }
   0x4   :  { %16 = vsyncpa [#allocation6], 0  ;;  %s675_s29 = smov [#allocation3]   ;;  %s627_s11 = scalar_lea.hbm %s867_s0, 1024 }
   0x5   :  { %s22_s30 = sshll.u32 %s675_s29, 4  ;;  %p628_p0 = scmp.ne.s32.totalorder %s867_s0, %s627_s11  ;;  %s23_s30 = int_to_ptr.vmem [resolvable:$true] %s22_s30 }
   0x6   :  { %p631_p1 = scmp.lt.u32.totalorder %s627_s11, %s867_s0 }
   0x8   :  { %p633_p2 = pnand %p631_p1, %p628_p0 }
   0xa   :  { %636 = shalt.err (!%p633_p2)
}
   0xb   :  { %s637_s7 = scalar_lea.vmem %s23_s30, 1024  ;;  %p642_p4 = scmp.lt.s32.totalorder %s23_s30, %s23_s30 }
   0xc   :  { %p638_p3 = scmp.ne.s32.totalorder %s23_s30, %s637_s7  ;;  %p643_p5 = scmp.lt.s32.totalorder %s637_s7, %s637_s7 }
   0xe   :  { %p644_p6 = por %p643_p5, %p642_p4 }
  0x10   :  { %p645_p7 = pnand %p644_p6, %p638_p3 }
  0x12   :  { %648 = shalt.err (!%p645_p7)
}
  0x13   :  { %s676_s16 = smov 128   ;;  %s677_s17 = smov 8  }
  0x14   :  { %28 = dma.hbm_to_vmem [thread:$0]  %s867_s0, 1024, %s23_s30, [#allocation4], %s676_s16, %s676_s16, %s677_s17  }
  0x15   :  { %s678_s20 = smov [#allocation5]   ;;  %s649_s24 = scalar_lea.hbm %s868_s1, 16 }
  0x16   :  { %s35_s21 = sshll.u32 %s678_s20, 4  ;;  %p650_p8 = scmp.ne.s32.totalorder %s868_s1, %s649_s24  ;;  %s36_s21 = int_to_ptr.vmem [resolvable:$true] %s35_s21 }
  0x17   :  { %p653_p9 = scmp.lt.u32.totalorder %s649_s24, %s868_s1 }
  0x19   :  { %p655_p10 = pnand %p653_p9, %p650_p8 }
  0x1b   :  { %658 = shalt.err (!%p655_p10)
}
  0x1c   :  { %s659_s29 = scalar_lea.vmem %s36_s21, 16  ;;  %s663_s0 = scalar_lea.vmem %s36_s21, 32 }
  0x1d   :  { %p660_p11 = scmp.ne.s32.totalorder %s36_s21, %s659_s29  ;;  %p664_p12 = scmp.lt.s32.totalorder %s36_s21, %s36_s21 }
  0x1e   :  { %p665_p13 = scmp.lt.s32.totalorder %s663_s0, %s659_s29 }
  0x20   :  { %p666_p0 = por %p665_p13, %p664_p12 }
  0x22   :  { %p667_p1 = pnand %p666_p0, %p660_p11 }
  0x24   :  { %670 = shalt.err (!%p667_p1)
}
  0x25   :  { %38 = dma.hbm_to_vmem [thread:$0]  %s868_s1, 16, %s36_s21, [#allocation6]  }
  0x26   :  { %671 = dma.done.wait [#allocation4], 1024  }
  0x27   :  { %672 = vsyncadd [#allocation4], 4294966272 }
  0x28   :  { %673 = dma.done.wait [#allocation6], 16  }
  0x29   :  { %674 = vsyncadd [#allocation6], 4294967280  ;;  %v755_v1 = vld [vmem:[#allocation3 + $0x10] sm:$0xff]  ;;  %v569_v2 = vld [vmem:[#allocation5] ss:$0 sm:$0xff]  ;;  %vm80_vm0 = vcmask 130048   ;;  %v122_v31 = vlaneseq }
  0x2a   :  { %v757_v3 = vld [vmem:[#allocation3] sm:$0xff]  ;;  %v74_v4 = vmul.f32 %v569_v2, %v755_v1  ;;  %v761_v6 = vld [vmem:[#allocation3 + $0x18] sm:$0xff]  ;;  %v763_v7 = vld [vmem:[#allocation3 + $0x8] sm:$0xff]  ;;  %v679_v29 = vmov 0.0|0.0   ;;  %vm680_vm1 = vmmov 0   ;;  %v681_v30 = vmov 0.0  }
  0x2b   :  { %v72_v5 = vmul.f32 %v569_v2, %v757_v3  ;;  %v75_v8 = vmul.f32 %v569_v2, %v761_v6  ;;  %v73_v9 = vmul.f32 %v569_v2, %v763_v7  ;;  %v767_v10 = vld [vmem:[#allocation3 + $0x28] sm:$0xff]  ;;  %v769_v11 = vld [vmem:[#allocation3 + $0x20] sm:$0xff]  ;;  %v777_v18 = vld [vmem:[#allocation3 + $0x38] sm:$0xff]  ;;  %606 = vmatprep.subr.bf16.mxu0 %v679_v29  ;;  %609 = vmatprep.subr.bf16.mxu1 %v679_v29  ;;  %v123_v32 = vand.u32 127, %v122_v31 }
  0x2c   :  { %v87_v12 = vsel %vm80_vm0, %v74_v4, 0.0  ;;  %v77_v16 = vmul.f32 %v569_v2, %v767_v10  ;;  %v76_v17 = vmul.f32 %v569_v2, %v769_v11  ;;  %v779_v19 = vld [vmem:[#allocation3 + $0x30] sm:$0xff]  ;;  %v79_v22 = vmul.f32 %v569_v2, %v777_v18  ;;  %v105_v26 = vld [vmem:[%s869_s2] sm:$0xff]  ;;  %v106_v27 = vld [vmem:[%s869_s2 + $0x8] sm:$0xff]  ;;  %589 = vmatprep.mubr.msk.f32.mxu0 %vm680_vm1, %v681_v30  ;;  %596 = vmatprep.mubr.msk.f32.mxu1 %vm680_vm1, %v681_v30 }
  0x2d   :  { %v81_v13 = vsel %vm80_vm0, %v72_v5, 0.0  ;;  %88 = vadd.xlane.f32.xlu1 %v87_v12  ;;  %v90_v14 = vsel %vm80_vm0, %v75_v8, 0.0  ;;  %v84_v15 = vsel %vm80_vm0, %v73_v9, 0.0  ;;  %v78_v23 = vmul.f32 %v569_v2, %v779_v19  ;;  %v570_v60 = vld [vmem:[%s871_s4] ss:$0 sm:$0xff] }
  0x2e   :  { %82 = vadd.xlane.f32.xlu0 %v81_v13  ;;  %v96_v20 = vsel %vm80_vm0, %v77_v16, 0.0  ;;  %v93_v21 = vsel %vm80_vm0, %v76_v17, 0.0  ;;  %v102_v24 = vsel %vm80_vm0, %v79_v22, 0.0  ;;  %v607_v28 = vpack.c.bf16 %v106_v27, %v105_v26  ;;  %v252_v12 = vld [vmem:[%s870_s3] sm:$0xff]  ;;  %v253_v13 = vld [vmem:[%s870_s3 + $0x8] sm:$0xff] }
  0x2f   :  { %v99_v25 = vsel %vm80_vm0, %v78_v23, 0.0  ;;  %v128_v33 = vadd.s32 4294967288, %v123_v32  ;;  %v795_v36 = vshrl.u32 %v122_v31, 7  ;;  %vm133_vm2 = vcmask 130112  }
  0x30   :  { %608 = vmatpush3.bf16.msra.mxu0 %v607_v28  ;;  %vm162_vm3 = vcmask 1041409   ;;  %vm164_vm4 = vcmask 1042434   ;;  %vm166_vm5 = vcmask 1043459   ;;  %vm240_vm6 = vcmask 125952  }
  0x31   :  { %91 = vadd.xlane.f32.xlu1 %v90_v14  ;;  %612 = vmatprep.subr.bf16.mxu0 %v679_v29  ;;  %v131_v37 = vsub.s32 %v128_v33, %v795_v36  ;;  %v126_v40 = vsub.s32 %v123_v32, %v795_v36  ;;  %v610_v14 = vpack.c.bf16 %v253_v13, %v252_v12  ;;  %v340_v26 = vsub.s32 0, %v795_v36  ;;  %v438_v33 = vld [vmem:[%s873_s6] sm:$0xff] }
  0x32   :  { %85 = vadd.xlane.f32.xlu0 %v84_v15  ;;  %v373_v28 = vsub.s32 3, %v795_v36  ;;  %vm558_vm7 = vcmask 0  }
  0x33   :  { %611 = vmatpush3.bf16.msra.mxu1 %v610_v14 }
  0x35   :  { %97 = vadd.xlane.f32.xlu1 %v96_v20  ;;  %v351_v20 = vsub.s32 1, %v795_v36 }
  0x36   :  { %94 = vadd.xlane.f32.xlu0 %v93_v21 }
  0x39   :  { %103 = vadd.xlane.f32.xlu1 %v102_v24  ;;  %v362_v24 = vsub.s32 2, %v795_v36 }
  0x3a   :  { %100 = vadd.xlane.f32.xlu0 %v99_v25 }
  0xba   :  { %v89_v34 = vpop.xlane.xlu1 %88 }
  0xbb   :  { %v83_v35 = vpop.xlane.xlu0 %82  ;;  %v138_v45 = vrot.slane %v89_v34, %v126_v40  ;;  %v439_v34 = vld [vmem:[%s873_s6 + $0x8] sm:$0xff] }
  0xbc   :  { %v127_v46 = vrot.slane %v83_v35, %v126_v40  ;;  %v613_v35 = vpack.c.bf16 %v439_v34, %v438_v33 }
  0xbe   :  { %v92_v38 = vpop.xlane.xlu1 %91 }
  0xbf   :  { %v86_v39 = vpop.xlane.xlu0 %85  ;;  %v142_v41 = vrot.slane %v92_v38, %v131_v37 }
  0xc0   :  { %v132_v42 = vrot.slane %v86_v39, %v131_v37 }
  0xc1   :  { %v143_v49 = vsel %vm133_vm2, %v142_v41, %v138_v45 }
  0xc2   :  { %v98_v43 = vpop.xlane.xlu1 %97  ;;  %v134_v50 = vsel %vm133_vm2, %v132_v42, %v127_v46 }
  0xc3   :  { %v95_v44 = vpop.xlane.xlu0 %94  ;;  %v151_v47 = vrot.slane %v98_v43, %v131_v37  ;;  %v163_v56 = vsel %vm162_vm3, %v143_v49, %v134_v50 }
  0xc4   :  { %v147_v48 = vrot.slane %v95_v44, %v126_v40 }
  0xc6   :  { %v152_v51 = vsel %vm133_vm2, %v151_v47, %v147_v48  ;;  %v104_v52 = vpop.xlane.xlu1 %103 }
  0xc7   :  { %v101_v53 = vpop.xlane.xlu0 %100  ;;  %v160_v54 = vrot.slane %v104_v52, %v131_v37  ;;  %v165_v58 = vsel %vm164_vm4, %v152_v51, %v163_v56 }
  0xc8   :  { %v156_v55 = vrot.slane %v101_v53, %v126_v40 }
  0xca   :  { %v161_v57 = vsel %vm133_vm2, %v160_v54, %v156_v55 }
  0xcb   :  { %v167_v59 = vsel %vm166_vm5, %v161_v57, %v165_v58 }
  0xcc   :  { %590 = vmatmul.mubr.msk.f32.vlgmr.msra.gmra.mrb[0].mxu0 %vm80_vm0, %v167_v59 }
  0xcd   :  { %603 = vmatprep.mubr.msk.f32.mxu0 %vm680_vm1, %v681_v30  ;;  %v573_v30 = vld [vmem:[%s872_s5] ss:$0 sm:$0xff]  ;;  %614 = vmatpush3.bf16.msra.mxu0 %v613_v35 }
 0x19f   :  { %v236_v61 = vpop.f32.mrb[0].mxu0 }
 0x1a0   :  { %v237_v62 = vadd.f32 %v570_v60, %v236_v61  ;;  %v591_v63 = vpop.f32.mrb[1].mxu0 }
 0x1a2   :  { %v241_v0 = vsel %vm240_vm6, %v237_v62, -inf }
 0x1a3   :  { %242 = vmax.xlane.f32.xlu0 %v241_v0 }
 0x230   :  { %v243_v2 = vpop.xlane.xlu0 %242 }
 0x231   :  { %v244_v4 = vsub.f32 %v237_v62, %v243_v2 }
 0x233   :  { %v245_v5 = vmul.f32 1.442695, %v244_v4 }
 0x235   :  { %623 = vpow2.f32 %v245_v5 }
 0x23f   :  { %v624_v8 = vpop.eup %623 }
 0x240   :  { %v247_v9 = vsel %vm240_vm6, %v624_v8, 0.0 }
 0x241   :  { %248 = vadd.xlane.f32.xlu1 %v247_v9 }
 0x2ce   :  { %v249_v15 = vpop.xlane.xlu1 %248 }
 0x2cf   :  { %625 = vrcp.f32 %v249_v15 }
 0x2d9   :  { %v626_v16 = vpop.eup %625 }
 0x2da   :  { %v251_v17 = vmul.f32 %v626_v16, %v624_v8 }
 0x2dc   :  { %597 = vmatmul.mubr.msk.f32.vlgmr.msra.gmra.mrb[0].mxu1 %vm80_vm0, %v251_v17  ;;  %v334_v31 = vmul.f32 %v573_v30, %v251_v17 }
 0x2de   :  { %v335_v32 = vsel %vm240_vm6, %v334_v31, 0.0 }
 0x3af   :  { %v323_v21 = vpop.f32.mrb[0].mxu1 }
 0x3b0   :  { %v598_v22 = vpop.f32.mrb[1].mxu1  ;;  %v352_v23 = vrot.slane %v323_v21, %v351_v20  ;;  %v363_v25 = vrot.slane %v323_v21, %v362_v24  ;;  %v341_v27 = vrot.slane %v323_v21, %v340_v26  ;;  %v374_v29 = vrot.slane %v323_v21, %v373_v28 }
 0x3b2   :  { %358 = vbcast.lane.b32.xlu1 %v352_v23, 264  ;;  %354 = vbcast.lane.b32.xlu0 %v352_v23, 256 }
 0x3b6   :  { %365 = vbcast.lane.b32.xlu0 %v363_v25, 256 }
 0x3ba   :  { %369 = vbcast.lane.b32.xlu0 %v363_v25, 264 }
 0x3be   :  { %343 = vbcast.lane.b32.xlu0 %v341_v27, 256 }
 0x3c2   :  { %347 = vbcast.lane.b32.xlu0 %v341_v27, 264 }
 0x3c6   :  { %376 = vbcast.lane.b32.xlu0 %v374_v29, 256 }
 0x3ca   :  { %380 = vbcast.lane.b32.xlu0 %v374_v29, 264 }
 0x3d6   :  { %336 = vadd.xlane.f32.xlu1 %v335_v32 }
 0x424   :  { %v355_v37 = vpop.permute.xlu0 %354  ;;  %v359_v43 = vpop.permute.xlu1 %358 }
 0x425   :  { %v385_v45 = vmul.f32 %v359_v43, %v761_v6  ;;  %v384_v46 = vmul.f32 %v355_v37, %v755_v1  ;;  %v574_v43 = vld [vmem:[#allocation2] ss:$0 sm:$0xff] }
 0x427   :  { %v400_v52 = vsel %vm80_vm0, %v385_v45, 0.0  ;;  %v399_v53 = vsel %vm80_vm0, %v384_v46, 0.0 }
 0x428   :  { %v366_v38 = vpop.permute.xlu0 %365  ;;  %v401_v55 = vadd.f32 %v400_v52, %v399_v53 }
 0x429   :  { %v386_v49 = vmul.f32 %v366_v38, %v769_v11 }
 0x42a   :  { %v402_v58 = vrot.slane %v401_v55, 4 }
 0x42c   :  { %v370_v39 = vpop.permute.xlu0 %369  ;;  %v403_v62 = vadd.f32 %v402_v58, %v401_v55 }
 0x42d   :  { %v387_v47 = vmul.f32 %v370_v39, %v767_v10  ;;  %v408_v10 = vsel %vm80_vm0, %v386_v49, 0.0 }
 0x42e   :  { %v404_v2 = vrot.slane %v403_v62, 2 }
 0x42f   :  { %v409_v54 = vsel %vm80_vm0, %v387_v47, 0.0 }
 0x430   :  { %v344_v40 = vpop.permute.xlu0 %343  ;;  %v405_v9 = vadd.f32 %v404_v2, %v403_v62 }
 0x431   :  { %v382_v6 = vmul.f32 %v344_v40, %v757_v3  ;;  %v682_v40 = vmov 1966171168  }
 0x432   :  { %v406_v15 = vrot.slane %v405_v9, 1 }
 0x434   :  { %v348_v41 = vpop.permute.xlu0 %347  ;;  %v407_v22 = vadd.f32 %v406_v15, %v405_v9 }
 0x435   :  { %v383_v50 = vmul.f32 %v348_v41, %v763_v7  ;;  %v531_v41 = vunpack.c.l.s4 %v682_v40 }
 0x437   :  { %v391_v11 = vsel %vm80_vm0, %v383_v50, 0.0 }
 0x438   :  { %v377_v42 = vpop.permute.xlu0 %376 }
 0x439   :  { %v388_v51 = vmul.f32 %v377_v42, %v779_v19  ;;  %v390_v19 = vsel %vm80_vm0, %v382_v6, 0.0  ;;  %v532_v42 = vunpack.c.0.s8 %v531_v41 }
 0x43a   :  { %v392_v57 = vadd.f32 %v391_v11, %v390_v19 }
 0x43b   :  { %v417_v7 = vsel %vm80_vm0, %v388_v51, 0.0 }
 0x43c   :  { %v381_v44 = vpop.permute.xlu0 %380  ;;  %v393_v61 = vrot.slane %v392_v57, 4 }
 0x43d   :  { %v389_v48 = vmul.f32 %v381_v44, %v777_v18  ;;  %v410_v18 = vadd.f32 %v409_v54, %v408_v10  ;;  %v535_v44 = vsub.s32 %v532_v42, %v795_v36 }
 0x43e   :  { %v394_v0 = vadd.f32 %v393_v61, %v392_v57 }
 0x43f   :  { %v418_v1 = vsel %vm80_vm0, %v389_v48, 0.0  ;;  %v411_v59 = vrot.slane %v410_v18, 4 }
 0x440   :  { %v419_v56 = vadd.f32 %v418_v1, %v417_v7  ;;  %v395_v8 = vrot.slane %v394_v0, 2 }
 0x441   :  { %v412_v3 = vadd.f32 %v411_v59, %v410_v18 }
 0x442   :  { %v420_v60 = vrot.slane %v419_v56, 4  ;;  %v396_v14 = vadd.f32 %v395_v8, %v394_v0 }
 0x443   :  { %v413_v4 = vrot.slane %v412_v3, 2 }
 0x444   :  { %v421_v63 = vadd.f32 %v420_v60, %v419_v56  ;;  %v397_v20 = vrot.slane %v396_v14, 1 }
 0x445   :  { %v414_v12 = vadd.f32 %v413_v4, %v412_v3 }
 0x446   :  { %v422_v5 = vrot.slane %v421_v63, 2  ;;  %v398_v28 = vadd.f32 %v397_v20, %v396_v14 }
 0x447   :  { %v415_v16 = vrot.slane %v414_v12, 1 }
 0x448   :  { %v423_v13 = vadd.f32 %v422_v5, %v421_v63 }
 0x449   :  { %v416_v23 = vadd.f32 %v415_v16, %v414_v12 }
 0x44a   :  { %v424_v17 = vrot.slane %v423_v13, 1 }
 0x44c   :  { %v425_v24 = vadd.f32 %v424_v17, %v423_v13 }
 0x463   :  { %v337_v21 = vpop.xlane.xlu1 %336 }
 0x464   :  { %v427_v25 = vrot.slane %v337_v21, 1  ;;  %v428_v26 = vrot.slane %v337_v21, 2  ;;  %v429_v27 = vrot.slane %v337_v21, 3  ;;  %v434_v32 = vadd.f32 %v398_v28, %v337_v21 }
 0x466   :  { %v435_v29 = vadd.f32 %v427_v25, %v407_v22  ;;  %v436_v30 = vadd.f32 %v428_v26, %v416_v23  ;;  %v437_v31 = vadd.f32 %v429_v27, %v425_v24 }
 0x468   :  { %v451_v33 = vrot.slane %v435_v29, 7  ;;  %v453_v34 = vrot.slane %v436_v30, 6  ;;  %v455_v37 = vrot.slane %v437_v31, 5 }
 0x46a   :  { %v452_v35 = vsel %vm162_vm3, %v451_v33, %v434_v32 }
 0x46b   :  { %v454_v38 = vsel %vm164_vm4, %v453_v34, %v452_v35 }
 0x46c   :  { %v456_v39 = vsel %vm166_vm5, %v455_v37, %v454_v38 }
 0x46d   :  { %604 = vmatmul.mubr.msk.f32.vlgmr.msra.gmra.mrb[2].mxu0 %vm80_vm0, %v456_v39 }
 0x540   :  { %v525_v45 = vpop.f32.mrb[2].mxu0 }
 0x541   :  { %v526_v46 = vadd.f32 %v574_v43, %v525_v45  ;;  %v605_v47 = vpop.f32.mrb[3].mxu0 }
 0x543   :  { %v536_v48 = vrot.slane %v526_v46, %v535_v44 }
 0x545   :  { %v537_v49 = vcombine.high %v536_v48, %v536_v48  ;;  %v544_v50 = vrot.slane %v536_v48, %v535_v44 }
 0x547   :  { %v551_v51 = vrot.slane %v537_v49, %v535_v44  ;;  %v552_v52 = vcombine.high %v544_v50, %v544_v50  ;;  %559 = vst.msk [vmem:[%s875_s8] sm:$0x1] %vm558_vm7, %v544_v50 }
 0x549   :  { %v553_v53 = vcombine.high %v551_v51, %v551_v51  ;;  %560 = vst.msk [vmem:[%s875_s8 + $0x1] sm:$0x1] %vm558_vm7, %v551_v51  ;;  %561 = vst.msk [vmem:[%s875_s8 + $0x2] sm:$0x1] %vm558_vm7, %v552_v52 }
 0x54b   :  { %562 = vst.msk [vmem:[%s875_s8 + $0x3] sm:$0x1] %vm558_vm7, %v553_v53 }
 0x54c   :  { %567 = vsyncpa [#allocation4], 1 }
 0x54d   :  { %568 = vsyncpa [#allocation6], 1 }

</bundles_post_ra>
